<compile_context>
chip_gen: v7x
topology: tpu7x:2x2x1
jax: 0.10.0
libtpu: 0.0.40
codegen_flags: <defaults>
</compile_context>

<pallas_src>
import functools

import jax
import jax.numpy as jnp
from jax.experimental import pallas as pl
from jax.experimental.pallas import tpu as pltpu


# --------------------------------- kernel -----------------------------------

def attention_kernel(x_ref, wqkv_ref, bqkv_ref, wp_ref, bp_ref,
                     g_sa_ref, b_sa_ref, g_fc_ref, b_fc_ref, o_ref,
                     *, num_heads, b_blk, mm_dtype, eps=1e-5):
    H = num_heads
    _, N, C = x_ref.shape
    d = C // H
    M = b_blk * N                           # rows fed to every projection matmul

    x = x_ref[...].reshape(M, C)            # (B_blk, N, C) -> (M, C): leading merge
    xm = x.astype(mm_dtype)

    # ---- fused QKV projection: one (M,C)x(C,3C) MXU matmul, f32 accumulation.
    # The softmax scale is already folded into the Q third of wqkv/bqkv.
    qkv = jnp.dot(xm, wqkv_ref[...], preferred_element_type=jnp.float32)
    qkv = qkv + bqkv_ref[...]

    # C-aligned slices; cast to the MXU dtype BEFORE the per-head relayout so
    # the head-reshuffle copies move half the bytes when mm_dtype is bf16.
    qm = qkv[:, :C].astype(mm_dtype)
    km = qkv[:, C:2 * C].astype(mm_dtype)
    vm = qkv[:, 2 * C:].astype(mm_dtype)

    def to_heads(t):                        # (M, C) -> (H*B_blk, N, d), head-major
        return jnp.concatenate(
            [t[:, h * d:(h + 1) * d].reshape(b_blk, N, d) for h in range(H)],
            axis=0)

    qs, ks, vs = to_heads(qm), to_heads(km), to_heads(vm)

    # ---- one batched contraction + one softmax epilogue for all (head, batch)
    # pairs (attn_drop is Identity in the module config).
    s = jnp.einsum('znd,zmd->znm', qs, ks, preferred_element_type=jnp.float32)
    s = s - jnp.max(s, axis=-1, keepdims=True)
    p = jnp.exp(s)
    p = p / jnp.sum(p, axis=-1, keepdims=True)      # exact (approx recip failed tol)
    ao = jnp.einsum('znm,zmd->znd', p.astype(mm_dtype), vs,
                    preferred_element_type=jnp.float32)          # (Z, N, d) f32

    # merge heads back to (M, C); stays in registers (no VMEM scratch round trip)
    attn_out = jnp.concatenate(
        [ao[h * b_blk:(h + 1) * b_blk].reshape(M, d) for h in range(H)], axis=-1)

    inv_c = 1.0 / C

    def ln_relu6(t, g_ref, b_ref):
        # two-pass LayerNorm (numerically safe) + affine + ReLU6
        mu = jnp.sum(t, axis=-1, keepdims=True) * inv_c
        tc = t - mu
        var = jnp.maximum(jnp.sum(tc * tc, axis=-1, keepdims=True) * inv_c, 0.0)
        y = tc * jax.lax.rsqrt(var + eps) * g_ref[...] + b_ref[...]
        return jnp.clip(y, 0.0, 6.0)

    # x = x + relu6(norm_sa(attn));  x = x + relu6(norm_fc(proj(x)))
    # (proj_drop is Identity in the module config)
    x1 = x + ln_relu6(attn_out, g_sa_ref, b_sa_ref)
    y = jnp.dot(x1.astype(mm_dtype), wp_ref[...],
                preferred_element_type=jnp.float32) + bp_ref[...]
    out = x1 + ln_relu6(y, g_fc_ref, b_fc_ref)

    o_ref[...] = out.reshape(b_blk, N, C).astype(o_ref.dtype)


# -------------------------------- wrapper ------------------------------------

def _vmem_capacity_bytes():
    """Per-TensorCore VMEM capacity; conservative (v7x-sized) fallback."""
    try:
        cap = int(getattr(pltpu.get_tpu_info(), "vmem_capacity_bytes"))
        if cap > 0:
            return cap
    except Exception:
        pass
    return 64 * 1024 * 1024


def _pick_batch_block(B, N, C, H, *, x_bytes, w_bytes, mm_bytes, budget_bytes,
                      max_rows=4096):
    """Largest divisor of B (capped at B//2 so the batch grid has >= 2 steps
    for v7x's two TensorCores) whose per-step VMEM footprint fits the
    generation-aware budget."""
    cap = max(1, B // 2)
    best = 1
    for cand in range(1, cap + 1):
        if B % cand:
            continue
        rows = cand * N
        if rows > max_rows:
            continue
        est = (4 * rows * C * x_bytes               # double-buffered x + out blocks
               + 2 * 4 * C * C * w_bytes            # double-buffered Wqkv(C,3C)+Wp(C,C)
               + 4 * rows * 3 * C                   # f32 fused-qkv result
               + 3 * rows * C * mm_bytes            # head-major q/k/v copies
               + cand * H * N * N * (8 + mm_bytes)  # scores + probs f32 + probs cast
               + 6 * rows * C * 4)                  # ao/attn_out/x1/y/out + headroom
        if est <= budget_bytes:
            best = cand
    return best


@functools.lru_cache(maxsize=None)
def _build_attention_call(B, N, C, out_dtype, num_heads, b_blk, mm_dtype,
                          vmem_limit_bytes):
    kernel = functools.partial(attention_kernel, num_heads=num_heads,
                               b_blk=b_blk, mm_dtype=mm_dtype)
    blk_spec = pl.BlockSpec((b_blk, N, C), lambda b: (b, 0, 0))
    # Grid-invariant weights / params (constant index_map -> fetched once;
    # bf16 weights already halve their double-buffered VMEM footprint).
    wqkv_spec = pl.BlockSpec((C, 3 * C), lambda b: (0, 0))
    bqkv_spec = pl.BlockSpec((1, 3 * C), lambda b: (0, 0))
    wp_spec = pl.BlockSpec((C, C), lambda b: (0, 0))
    row_spec = pl.BlockSpec((1, C), lambda b: (0, 0))
    return pl.pallas_call(
        kernel,
        out_shape=jax.ShapeDtypeStruct((B, N, C), out_dtype),
        grid_spec=pltpu.PrefetchScalarGridSpec(
            num_scalar_prefetch=0,
            grid=(B // b_blk,),
            in_specs=[blk_spec,
                      wqkv_spec, bqkv_spec,     # fused qkv (scale pre-folded)
                      wp_spec, row_spec,        # output projection
                      row_spec, row_spec,       # norm_sa gamma / beta
                      row_spec, row_spec],      # norm_fc gamma / beta
            out_specs=blk_spec),
        compiler_params=pltpu.CompilerParams(
            # batch blocks are independent -> shard across v7x's two TCs
            dimension_semantics=("parallel",),
            vmem_limit_bytes=vmem_limit_bytes),
    )


def attention_forward(x, wq, bq, wkv, bkv, wp, bp, g_sa, b_sa, g_fc, b_fc,
                      *, num_heads, matmul_dtype=jnp.bfloat16):
    """Fused ViT Attention-block forward.

    Weights are stored as (in, out) (transposed nn.Linear.weight); biases and
    LayerNorm affine params are 1-D (length C; bkv: 2C).  matmul_dtype is the
    MXU input dtype (bf16 default = full MXU rate on v5e/v6e/v7x and halved
    weight DMA/VMEM); accumulation and the LN/elementwise path stay f32.
    """
    B, N, C = x.shape
    assert C % num_heads == 0
    # TODO(synk): for real ViT shapes (N=197, C not a multiple of 128) pad N to a
    # multiple of 8 and C to a multiple of 128 here (once, outside the kernel)
    # for sublane/lane-dense loads and unmasked stores.
    scale = (C // num_heads) ** -0.5

    # Trace-time weight prep: fold the softmax scale into the Q projection and
    # fuse q + kv into one (C, 3C) weight -> a single large-K MXU matmul with
    # C-aligned q/k/v slices in the kernel.  Biases / LN params stay f32.
    wqkv = jnp.concatenate([wq * scale, wkv], axis=1).astype(matmul_dtype)
    bqkv = jnp.concatenate([bq * scale, bkv], axis=0).reshape(1, 3 * C)
    wp_m = wp.astype(matmul_dtype)
    row = lambda t: t.reshape(1, C)

    cap = _vmem_capacity_bytes()
    budget = cap // 2                    # ~32 MiB on v7x, ~64 MiB on v5e/v6e
    vmem_limit = (cap * 3) // 4          # ~48 MiB on v7x, ~96 MiB on v5e/v6e
    mm_bytes = jnp.dtype(matmul_dtype).itemsize
    b_blk = _pick_batch_block(B, N, C, num_heads,
                              x_bytes=jnp.dtype(x.dtype).itemsize,
                              w_bytes=mm_bytes, mm_bytes=mm_bytes,
                              budget_bytes=budget)

    call = _build_attention_call(B, N, C, jnp.dtype(x.dtype), num_heads, b_blk,
                                 matmul_dtype, vmem_limit)
    return call(x, wqkv, bqkv, wp_m, row(bp), row(g_sa), row(b_sa),
                row(g_fc), row(b_fc))


# ----------------------------- pure-JAX reference ----------------------------

def attention_reference(x, wq, bq, wkv, bkv, wp, bp, g_sa, b_sa, g_fc, b_fc,
                        *, num_heads):
    B, N, C = x.shape
    d = C // num_heads
    scale = d ** -0.5

    def ln(t, g, b, eps=1e-5):
        mu = t.mean(-1, keepdims=True)
        var = ((t - mu) ** 2).mean(-1, keepdims=True)
        return (t - mu) / jnp.sqrt(var + eps) * g + b

    relu6 = lambda t: jnp.clip(t, 0.0, 6.0)

    q = (x @ wq + bq).reshape(B, N, num_heads, d).transpose(0, 2, 1, 3)
    kv = (x @ wkv + bkv).reshape(B, N, 2, num_heads, d).transpose(2, 0, 3, 1, 4)
    k, v = kv[0], kv[1]
    attn = jnp.einsum('bhnd,bhmd->bhnm', q, k) * scale
    attn = jax.nn.softmax(attn, axis=-1)
    out = jnp.einsum('bhnm,bhmd->bhnd', attn, v).transpose(0, 2, 1, 3).reshape(B, N, C)
    x1 = x + relu6(ln(out, g_sa, b_sa))
    y = x1 @ wp + bp
    return x1 + relu6(ln(y, g_fc, b_fc))


# ----------------------------------- main ------------------------------------

if __name__ == "__main__":
    B, N, C, H = 2, 8, 32, 8          # dim=32, num_heads=8 -> head_dim=4

    key = jax.random.PRNGKey(0)
    kx, kq, kkv, kp, kb, kg = jax.random.split(key, 6)

    x = jax.random.normal(kx, (B, N, C), dtype=jnp.float32)

    std = 0.02                         # trunc_normal_(std=0.02), stored (in, out)
    wq = (jax.random.truncated_normal(kq, -2.0, 2.0, (C, C)) * std).astype(jnp.float32)
    wkv = (jax.random.truncated_normal(kkv, -2.0, 2.0, (C, 2 * C)) * std).astype(jnp.float32)
    wp = (jax.random.truncated_normal(kp, -2.0, 2.0, (C, C)) * std).astype(jnp.float32)

    kb1, kb2, kb3 = jax.random.split(kb, 3)
    bq = 0.01 * jax.random.normal(kb1, (C,), dtype=jnp.float32)
    bkv = 0.01 * jax.random.normal(kb2, (2 * C,), dtype=jnp.float32)
    bp = 0.01 * jax.random.normal(kb3, (C,), dtype=jnp.float32)

    kg1, kg2, kg3, kg4 = jax.random.split(kg, 4)
    g_sa = 1.0 + 0.05 * jax.random.normal(kg1, (C,), dtype=jnp.float32)
    b_sa = 0.05 * jax.random.normal(kg2, (C,), dtype=jnp.float32)
    g_fc = 1.0 + 0.05 * jax.random.normal(kg3, (C,), dtype=jnp.float32)
    b_fc = 0.05 * jax.random.normal(kg4, (C,), dtype=jnp.float32)

    args = (x, wq, bq, wkv, bkv, wp, bp, g_sa, b_sa, g_fc, b_fc)
    ref = attention_reference(*args, num_heads=H)

    # Strict correctness gate: f32 MXU path (exact softmax denom, two-pass LN).
    out_f32 = jax.block_until_ready(
        attention_forward(*args, num_heads=H, matmul_dtype=jnp.float32))
    assert out_f32.shape == (B, N, C)
    err_f32 = float(jnp.max(jnp.abs(out_f32 - ref)))
    assert err_f32 < 5e-4, f"f32 path error too large: {err_f32}"

    # Production (default) path: bf16 MXU inputs, f32 accumulation.  Loose
    # sanity bound only — reduced-precision matmuls vs. the f32 reference.
    out_bf16 = jax.block_until_ready(attention_forward(*args, num_heads=H))
    assert out_bf16.shape == (B, N, C)
    assert bool(jnp.all(jnp.isfinite(out_bf16))), "bf16 path produced non-finite values"
    err_bf16 = float(jnp.max(jnp.abs(out_bf16 - ref)))
    assert err_bf16 < 0.5, f"bf16 path error too large: {err_bf16}"

    print("KERNEL_OK")
</pallas_src>

<mosaic_0001>
module attributes {stable_mosaic.version = 11 : i64} {
  func.func @attention_kernel(%arg0: i32, %arg1: memref<1x8x32xf32, #tpu.memory_space<vmem>>, %arg2: memref<32x96xf32, #tpu.memory_space<vmem>>, %arg3: memref<1x96xf32, #tpu.memory_space<vmem>>, %arg4: memref<32x32xf32, #tpu.memory_space<vmem>>, %arg5: memref<1x32xf32, #tpu.memory_space<vmem>>, %arg6: memref<1x32xf32, #tpu.memory_space<vmem>>, %arg7: memref<1x32xf32, #tpu.memory_space<vmem>>, %arg8: memref<1x32xf32, #tpu.memory_space<vmem>>, %arg9: memref<1x32xf32, #tpu.memory_space<vmem>>, %arg10: memref<1x8x32xf32, #tpu.memory_space<vmem>>) attributes {dimension_semantics = [#tpu.dimension_semantics<parallel>], iteration_bounds = array<i64: 2>, scalar_prefetch = 0 : i64, scratch_operands = 0 : i64, tpu.core_type = #tpu.core_type<tc>, window_params = [{transform_indices = @transform_0, window_bounds = array<i64: 1, 8, 32>}, {pipeline_mode = #tpu.pipeline_mode<synchronous>, transform_indices = @transform_1, window_bounds = array<i64: 32, 96>}, {pipeline_mode = #tpu.pipeline_mode<synchronous>, transform_indices = @transform_2, window_bounds = array<i64: 1, 96>}, {pipeline_mode = #tpu.pipeline_mode<synchronous>, transform_indices = @transform_3, window_bounds = array<i64: 32, 32>}, {pipeline_mode = #tpu.pipeline_mode<synchronous>, transform_indices = @transform_4, window_bounds = array<i64: 1, 32>}, {pipeline_mode = #tpu.pipeline_mode<synchronous>, transform_indices = @transform_5, window_bounds = array<i64: 1, 32>}, {pipeline_mode = #tpu.pipeline_mode<synchronous>, transform_indices = @transform_6, window_bounds = array<i64: 1, 32>}, {pipeline_mode = #tpu.pipeline_mode<synchronous>, transform_indices = @transform_7, window_bounds = array<i64: 1, 32>}, {pipeline_mode = #tpu.pipeline_mode<synchronous>, transform_indices = @transform_8, window_bounds = array<i64: 1, 32>}, {transform_indices = @transform_9, window_bounds = array<i64: 1, 8, 32>}]} {
    %c0 = arith.constant 0 : index
    %c0_0 = arith.constant 0 : index
    %c0_1 = arith.constant 0 : index
    %0 = vector.load %arg1[%c0, %c0_0, %c0_1] : memref<1x8x32xf32, #tpu.memory_space<vmem>>, vector<1x8x32xf32>
    %1 = vector.shape_cast %0 : vector<1x8x32xf32> to vector<8x32xf32>
    %c0_2 = arith.constant 0 : index
    %c0_3 = arith.constant 0 : index
    %2 = vector.load %arg2[%c0_2, %c0_3] : memref<32x96xf32, #tpu.memory_space<vmem>>, vector<32x96xf32>
    %cst = arith.constant dense<0.000000e+00> : vector<8x96xf32>
    %3 = tpu.matmul %1, %2, %cst {dimension_numbers = #tpu.dot_dimension_numbers<[1], [0], [0], [1], [0, 0, 1, 1], [], []>} : vector<8x32xf32>, vector<32x96xf32>, vector<8x96xf32> -> vector<8x96xf32>
    %c0_4 = arith.constant 0 : index
    %c0_5 = arith.constant 0 : index
    %4 = vector.load %arg3[%c0_4, %c0_5] : memref<1x96xf32, #tpu.memory_space<vmem>>, vector<1x96xf32>
    %5 = vector.broadcast %4 : vector<1x96xf32> to vector<8x96xf32>
    %6 = arith.addf %3, %5 : vector<8x96xf32>
    %7 = vector.extract_strided_slice %6 {offsets = [0, 0], sizes = [8, 32], strides = [1, 1]} : vector<8x96xf32> to vector<8x32xf32>
    %8 = vector.extract_strided_slice %6 {offsets = [0, 32], sizes = [8, 32], strides = [1, 1]} : vector<8x96xf32> to vector<8x32xf32>
    %9 = vector.extract_strided_slice %6 {offsets = [0, 64], sizes = [8, 32], strides = [1, 1]} : vector<8x96xf32> to vector<8x32xf32>
    %10 = vector.extract_strided_slice %7 {offsets = [0, 0], sizes = [8, 4], strides = [1, 1]} : vector<8x32xf32> to vector<8x4xf32>
    %11 = vector.shape_cast %10 : vector<8x4xf32> to vector<1x8x4xf32>
    %12 = vector.extract_strided_slice %7 {offsets = [0, 4], sizes = [8, 4], strides = [1, 1]} : vector<8x32xf32> to vector<8x4xf32>
    %13 = vector.shape_cast %12 : vector<8x4xf32> to vector<1x8x4xf32>
    %14 = vector.extract_strided_slice %7 {offsets = [0, 8], sizes = [8, 4], strides = [1, 1]} : vector<8x32xf32> to vector<8x4xf32>
    %15 = vector.shape_cast %14 : vector<8x4xf32> to vector<1x8x4xf32>
    %16 = vector.extract_strided_slice %7 {offsets = [0, 12], sizes = [8, 4], strides = [1, 1]} : vector<8x32xf32> to vector<8x4xf32>
    %17 = vector.shape_cast %16 : vector<8x4xf32> to vector<1x8x4xf32>
    %18 = vector.extract_strided_slice %7 {offsets = [0, 16], sizes = [8, 4], strides = [1, 1]} : vector<8x32xf32> to vector<8x4xf32>
    %19 = vector.shape_cast %18 : vector<8x4xf32> to vector<1x8x4xf32>
    %20 = vector.extract_strided_slice %7 {offsets = [0, 20], sizes = [8, 4], strides = [1, 1]} : vector<8x32xf32> to vector<8x4xf32>
    %21 = vector.shape_cast %20 : vector<8x4xf32> to vector<1x8x4xf32>
    %22 = vector.extract_strided_slice %7 {offsets = [0, 24], sizes = [8, 4], strides = [1, 1]} : vector<8x32xf32> to vector<8x4xf32>
    %23 = vector.shape_cast %22 : vector<8x4xf32> to vector<1x8x4xf32>
    %24 = vector.extract_strided_slice %7 {offsets = [0, 28], sizes = [8, 4], strides = [1, 1]} : vector<8x32xf32> to vector<8x4xf32>
    %25 = vector.shape_cast %24 : vector<8x4xf32> to vector<1x8x4xf32>
    %26 = tpu.concatenate %11, %13, %15, %17, %19, %21, %23, %25 in 0 : vector<1x8x4xf32>, vector<1x8x4xf32>, vector<1x8x4xf32>, vector<1x8x4xf32>, vector<1x8x4xf32>, vector<1x8x4xf32>, vector<1x8x4xf32>, vector<1x8x4xf32> -> vector<8x8x4xf32>
    %27 = vector.extract_strided_slice %8 {offsets = [0, 0], sizes = [8, 4], strides = [1, 1]} : vector<8x32xf32> to vector<8x4xf32>
    %28 = vector.shape_cast %27 : vector<8x4xf32> to vector<1x8x4xf32>
    %29 = vector.extract_strided_slice %8 {offsets = [0, 4], sizes = [8, 4], strides = [1, 1]} : vector<8x32xf32> to vector<8x4xf32>
    %30 = vector.shape_cast %29 : vector<8x4xf32> to vector<1x8x4xf32>
    %31 = vector.extract_strided_slice %8 {offsets = [0, 8], sizes = [8, 4], strides = [1, 1]} : vector<8x32xf32> to vector<8x4xf32>
    %32 = vector.shape_cast %31 : vector<8x4xf32> to vector<1x8x4xf32>
    %33 = vector.extract_strided_slice %8 {offsets = [0, 12], sizes = [8, 4], strides = [1, 1]} : vector<8x32xf32> to vector<8x4xf32>
    %34 = vector.shape_cast %33 : vector<8x4xf32> to vector<1x8x4xf32>
    %35 = vector.extract_strided_slice %8 {offsets = [0, 16], sizes = [8, 4], strides = [1, 1]} : vector<8x32xf32> to vector<8x4xf32>
    %36 = vector.shape_cast %35 : vector<8x4xf32> to vector<1x8x4xf32>
    %37 = vector.extract_strided_slice %8 {offsets = [0, 20], sizes = [8, 4], strides = [1, 1]} : vector<8x32xf32> to vector<8x4xf32>
    %38 = vector.shape_cast %37 : vector<8x4xf32> to vector<1x8x4xf32>
    %39 = vector.extract_strided_slice %8 {offsets = [0, 24], sizes = [8, 4], strides = [1, 1]} : vector<8x32xf32> to vector<8x4xf32>
    %40 = vector.shape_cast %39 : vector<8x4xf32> to vector<1x8x4xf32>
    %41 = vector.extract_strided_slice %8 {offsets = [0, 28], sizes = [8, 4], strides = [1, 1]} : vector<8x32xf32> to vector<8x4xf32>
    %42 = vector.shape_cast %41 : vector<8x4xf32> to vector<1x8x4xf32>
    %43 = tpu.concatenate %28, %30, %32, %34, %36, %38, %40, %42 in 0 : vector<1x8x4xf32>, vector<1x8x4xf32>, vector<1x8x4xf32>, vector<1x8x4xf32>, vector<1x8x4xf32>, vector<1x8x4xf32>, vector<1x8x4xf32>, vector<1x8x4xf32> -> vector<8x8x4xf32>
    %44 = vector.extract_strided_slice %9 {offsets = [0, 0], sizes = [8, 4], strides = [1, 1]} : vector<8x32xf32> to vector<8x4xf32>
    %45 = vector.shape_cast %44 : vector<8x4xf32> to vector<1x8x4xf32>
    %46 = vector.extract_strided_slice %9 {offsets = [0, 4], sizes = [8, 4], strides = [1, 1]} : vector<8x32xf32> to vector<8x4xf32>
    %47 = vector.shape_cast %46 : vector<8x4xf32> to vector<1x8x4xf32>
    %48 = vector.extract_strided_slice %9 {offsets = [0, 8], sizes = [8, 4], strides = [1, 1]} : vector<8x32xf32> to vector<8x4xf32>
    %49 = vector.shape_cast %48 : vector<8x4xf32> to vector<1x8x4xf32>
    %50 = vector.extract_strided_slice %9 {offsets = [0, 12], sizes = [8, 4], strides = [1, 1]} : vector<8x32xf32> to vector<8x4xf32>
    %51 = vector.shape_cast %50 : vector<8x4xf32> to vector<1x8x4xf32>
    %52 = vector.extract_strided_slice %9 {offsets = [0, 16], sizes = [8, 4], strides = [1, 1]} : vector<8x32xf32> to vector<8x4xf32>
    %53 = vector.shape_cast %52 : vector<8x4xf32> to vector<1x8x4xf32>
    %54 = vector.extract_strided_slice %9 {offsets = [0, 20], sizes = [8, 4], strides = [1, 1]} : vector<8x32xf32> to vector<8x4xf32>
    %55 = vector.shape_cast %54 : vector<8x4xf32> to vector<1x8x4xf32>
    %56 = vector.extract_strided_slice %9 {offsets = [0, 24], sizes = [8, 4], strides = [1, 1]} : vector<8x32xf32> to vector<8x4xf32>
    %57 = vector.shape_cast %56 : vector<8x4xf32> to vector<1x8x4xf32>
    %58 = vector.extract_strided_slice %9 {offsets = [0, 28], sizes = [8, 4], strides = [1, 1]} : vector<8x32xf32> to vector<8x4xf32>
    %59 = vector.shape_cast %58 : vector<8x4xf32> to vector<1x8x4xf32>
    %60 = tpu.concatenate %45, %47, %49, %51, %53, %55, %57, %59 in 0 : vector<1x8x4xf32>, vector<1x8x4xf32>, vector<1x8x4xf32>, vector<1x8x4xf32>, vector<1x8x4xf32>, vector<1x8x4xf32>, vector<1x8x4xf32>, vector<1x8x4xf32> -> vector<8x8x4xf32>
    "tpu.trace_start"() <{level = 10 : i32, message = "znd,zmd->znm"}> : () -> ()
    %cst_6 = arith.constant dense<0.000000e+00> : vector<8x8x8xf32>
    %61 = tpu.matmul %26, %43, %cst_6 {dimension_numbers = #tpu.dot_dimension_numbers<[2], [2], [1], [1], [0, 0, 0, 1, 1, 1], [0], [0]>} : vector<8x8x4xf32>, vector<8x8x4xf32>, vector<8x8x8xf32> -> vector<8x8x8xf32>
    "tpu.trace_stop"() : () -> ()
    %cst_7 = arith.constant dense<0xFF800000> : vector<8x8xf32>
    %62 = vector.multi_reduction <maximumf>, %61, %cst_7 [2] : vector<8x8x8xf32> to vector<8x8xf32>
    %63 = vector.shape_cast %62 : vector<8x8xf32> to vector<8x8x1xf32>
    %64 = vector.broadcast %63 : vector<8x8x1xf32> to vector<8x8x8xf32>
    %65 = arith.subf %61, %64 : vector<8x8x8xf32>
    %66 = math.exp %65 : vector<8x8x8xf32>
    %cst_8 = arith.constant dense<0.000000e+00> : vector<8x8xf32>
    %67 = vector.multi_reduction <add>, %66, %cst_8 [2] : vector<8x8x8xf32> to vector<8x8xf32>
    %68 = vector.shape_cast %67 : vector<8x8xf32> to vector<8x8x1xf32>
    %69 = vector.broadcast %68 : vector<8x8x1xf32> to vector<8x8x8xf32>
    %70 = arith.divf %66, %69 : vector<8x8x8xf32>
    "tpu.trace_start"() <{level = 10 : i32, message = "znm,zmd->znd"}> : () -> ()
    %cst_9 = arith.constant dense<0.000000e+00> : vector<8x8x4xf32>
    %71 = tpu.matmul %70, %60, %cst_9 {dimension_numbers = #tpu.dot_dimension_numbers<[2], [1], [1], [2], [0, 0, 0, 1, 1, 2], [0], [0]>} : vector<8x8x8xf32>, vector<8x8x4xf32>, vector<8x8x4xf32> -> vector<8x8x4xf32>
    "tpu.trace_stop"() : () -> ()
    %72 = vector.extract_strided_slice %71 {offsets = [0, 0, 0], sizes = [1, 8, 4], strides = [1, 1, 1]} : vector<8x8x4xf32> to vector<1x8x4xf32>
    %73 = vector.shape_cast %72 : vector<1x8x4xf32> to vector<8x4xf32>
    %74 = vector.extract_strided_slice %71 {offsets = [1, 0, 0], sizes = [1, 8, 4], strides = [1, 1, 1]} : vector<8x8x4xf32> to vector<1x8x4xf32>
    %75 = vector.shape_cast %74 : vector<1x8x4xf32> to vector<8x4xf32>
    %76 = vector.extract_strided_slice %71 {offsets = [2, 0, 0], sizes = [1, 8, 4], strides = [1, 1, 1]} : vector<8x8x4xf32> to vector<1x8x4xf32>
    %77 = vector.shape_cast %76 : vector<1x8x4xf32> to vector<8x4xf32>
    %78 = vector.extract_strided_slice %71 {offsets = [3, 0, 0], sizes = [1, 8, 4], strides = [1, 1, 1]} : vector<8x8x4xf32> to vector<1x8x4xf32>
    %79 = vector.shape_cast %78 : vector<1x8x4xf32> to vector<8x4xf32>
    %80 = vector.extract_strided_slice %71 {offsets = [4, 0, 0], sizes = [1, 8, 4], strides = [1, 1, 1]} : vector<8x8x4xf32> to vector<1x8x4xf32>
    %81 = vector.shape_cast %80 : vector<1x8x4xf32> to vector<8x4xf32>
    %82 = vector.extract_strided_slice %71 {offsets = [5, 0, 0], sizes = [1, 8, 4], strides = [1, 1, 1]} : vector<8x8x4xf32> to vector<1x8x4xf32>
    %83 = vector.shape_cast %82 : vector<1x8x4xf32> to vector<8x4xf32>
    %84 = vector.extract_strided_slice %71 {offsets = [6, 0, 0], sizes = [1, 8, 4], strides = [1, 1, 1]} : vector<8x8x4xf32> to vector<1x8x4xf32>
    %85 = vector.shape_cast %84 : vector<1x8x4xf32> to vector<8x4xf32>
    %86 = vector.extract_strided_slice %71 {offsets = [7, 0, 0], sizes = [1, 8, 4], strides = [1, 1, 1]} : vector<8x8x4xf32> to vector<1x8x4xf32>
    %87 = vector.shape_cast %86 : vector<1x8x4xf32> to vector<8x4xf32>
    %88 = tpu.concatenate %73, %75, %77, %79, %81, %83, %85, %87 in 1 : vector<8x4xf32>, vector<8x4xf32>, vector<8x4xf32>, vector<8x4xf32>, vector<8x4xf32>, vector<8x4xf32>, vector<8x4xf32>, vector<8x4xf32> -> vector<8x32xf32>
    %cst_10 = arith.constant dense<0.000000e+00> : vector<8xf32>
    %89 = vector.multi_reduction <add>, %88, %cst_10 [1] : vector<8x32xf32> to vector<8xf32>
    %90 = vector.shape_cast %89 : vector<8xf32> to vector<8x1xf32>
    %cst_11 = arith.constant 3.125000e-02 : f32
    %91 = vector.broadcast %cst_11 : f32 to vector<8x1xf32>
    %92 = arith.mulf %90, %91 : vector<8x1xf32>
    %93 = vector.broadcast %92 : vector<8x1xf32> to vector<8x32xf32>
    %94 = arith.subf %88, %93 : vector<8x32xf32>
    %95 = arith.mulf %94, %94 : vector<8x32xf32>
    %cst_12 = arith.constant dense<0.000000e+00> : vector<8xf32>
    %96 = vector.multi_reduction <add>, %95, %cst_12 [1] : vector<8x32xf32> to vector<8xf32>
    %97 = vector.shape_cast %96 : vector<8xf32> to vector<8x1xf32>
    %cst_13 = arith.constant 3.125000e-02 : f32
    %98 = vector.broadcast %cst_13 : f32 to vector<8x1xf32>
    %99 = arith.mulf %97, %98 : vector<8x1xf32>
    %cst_14 = arith.constant 0.000000e+00 : f32
    %100 = vector.broadcast %cst_14 : f32 to vector<8x1xf32>
    %101 = arith.maximumf %99, %100 : vector<8x1xf32>
    %cst_15 = arith.constant 9.99999974E-6 : f32
    %102 = vector.broadcast %cst_15 : f32 to vector<8x1xf32>
    %103 = arith.addf %101, %102 : vector<8x1xf32>
    %104 = math.rsqrt %103 : vector<8x1xf32>
    %105 = vector.broadcast %104 : vector<8x1xf32> to vector<8x32xf32>
    %106 = arith.mulf %94, %105 : vector<8x32xf32>
    %c0_16 = arith.constant 0 : index
    %c0_17 = arith.constant 0 : index
    %107 = vector.load %arg6[%c0_16, %c0_17] : memref<1x32xf32, #tpu.memory_space<vmem>>, vector<1x32xf32>
    %108 = vector.broadcast %107 : vector<1x32xf32> to vector<8x32xf32>
    %109 = arith.mulf %106, %108 : vector<8x32xf32>
    %c0_18 = arith.constant 0 : index
    %c0_19 = arith.constant 0 : index
    %110 = vector.load %arg7[%c0_18, %c0_19] : memref<1x32xf32, #tpu.memory_space<vmem>>, vector<1x32xf32>
    %111 = vector.broadcast %110 : vector<1x32xf32> to vector<8x32xf32>
    %112 = arith.addf %109, %111 : vector<8x32xf32>
    %cst_20 = arith.constant 0.000000e+00 : f32
    %cst_21 = arith.constant 6.000000e+00 : f32
    %113 = vector.broadcast %cst_20 : f32 to vector<8x32xf32>
    %114 = arith.maximumf %113, %112 : vector<8x32xf32>
    %115 = vector.broadcast %cst_21 : f32 to vector<8x32xf32>
    %116 = arith.minimumf %115, %114 : vector<8x32xf32>
    %117 = arith.addf %1, %116 : vector<8x32xf32>
    %c0_22 = arith.constant 0 : index
    %c0_23 = arith.constant 0 : index
    %118 = vector.load %arg4[%c0_22, %c0_23] : memref<32x32xf32, #tpu.memory_space<vmem>>, vector<32x32xf32>
    %cst_24 = arith.constant dense<0.000000e+00> : vector<8x32xf32>
    %119 = tpu.matmul %117, %118, %cst_24 {dimension_numbers = #tpu.dot_dimension_numbers<[1], [0], [0], [1], [0, 0, 1, 1], [], []>} : vector<8x32xf32>, vector<32x32xf32>, vector<8x32xf32> -> vector<8x32xf32>
    %c0_25 = arith.constant 0 : index
    %c0_26 = arith.constant 0 : index
    %120 = vector.load %arg5[%c0_25, %c0_26] : memref<1x32xf32, #tpu.memory_space<vmem>>, vector<1x32xf32>
    %121 = vector.broadcast %120 : vector<1x32xf32> to vector<8x32xf32>
    %122 = arith.addf %119, %121 : vector<8x32xf32>
    %cst_27 = arith.constant dense<0.000000e+00> : vector<8xf32>
    %123 = vector.multi_reduction <add>, %122, %cst_27 [1] : vector<8x32xf32> to vector<8xf32>
    %124 = vector.shape_cast %123 : vector<8xf32> to vector<8x1xf32>
    %cst_28 = arith.constant 3.125000e-02 : f32
    %125 = vector.broadcast %cst_28 : f32 to vector<8x1xf32>
    %126 = arith.mulf %124, %125 : vector<8x1xf32>
    %127 = vector.broadcast %126 : vector<8x1xf32> to vector<8x32xf32>
    %128 = arith.subf %122, %127 : vector<8x32xf32>
    %129 = arith.mulf %128, %128 : vector<8x32xf32>
    %cst_29 = arith.constant dense<0.000000e+00> : vector<8xf32>
    %130 = vector.multi_reduction <add>, %129, %cst_29 [1] : vector<8x32xf32> to vector<8xf32>
    %131 = vector.shape_cast %130 : vector<8xf32> to vector<8x1xf32>
    %cst_30 = arith.constant 3.125000e-02 : f32
    %132 = vector.broadcast %cst_30 : f32 to vector<8x1xf32>
    %133 = arith.mulf %131, %132 : vector<8x1xf32>
    %cst_31 = arith.constant 0.000000e+00 : f32
    %134 = vector.broadcast %cst_31 : f32 to vector<8x1xf32>
    %135 = arith.maximumf %133, %134 : vector<8x1xf32>
    %cst_32 = arith.constant 9.99999974E-6 : f32
    %136 = vector.broadcast %cst_32 : f32 to vector<8x1xf32>
    %137 = arith.addf %135, %136 : vector<8x1xf32>
    %138 = math.rsqrt %137 : vector<8x1xf32>
    %139 = vector.broadcast %138 : vector<8x1xf32> to vector<8x32xf32>
    %140 = arith.mulf %128, %139 : vector<8x32xf32>
    %c0_33 = arith.constant 0 : index
    %c0_34 = arith.constant 0 : index
    %141 = vector.load %arg8[%c0_33, %c0_34] : memref<1x32xf32, #tpu.memory_space<vmem>>, vector<1x32xf32>
    %142 = vector.broadcast %141 : vector<1x32xf32> to vector<8x32xf32>
    %143 = arith.mulf %140, %142 : vector<8x32xf32>
    %c0_35 = arith.constant 0 : index
    %c0_36 = arith.constant 0 : index
    %144 = vector.load %arg9[%c0_35, %c0_36] : memref<1x32xf32, #tpu.memory_space<vmem>>, vector<1x32xf32>
    %145 = vector.broadcast %144 : vector<1x32xf32> to vector<8x32xf32>
    %146 = arith.addf %143, %145 : vector<8x32xf32>
    %cst_37 = arith.constant 0.000000e+00 : f32
    %cst_38 = arith.constant 6.000000e+00 : f32
    %147 = vector.broadcast %cst_37 : f32 to vector<8x32xf32>
    %148 = arith.maximumf %147, %146 : vector<8x32xf32>
    %149 = vector.broadcast %cst_38 : f32 to vector<8x32xf32>
    %150 = arith.minimumf %149, %148 : vector<8x32xf32>
    %151 = arith.addf %117, %150 : vector<8x32xf32>
    %152 = vector.shape_cast %151 : vector<8x32xf32> to vector<1x8x32xf32>
    %c0_39 = arith.constant 0 : index
    %c0_40 = arith.constant 0 : index
    %c0_41 = arith.constant 0 : index
    %153 = vector.load %arg10[%c0_39, %c0_40, %c0_41] : memref<1x8x32xf32, #tpu.memory_space<vmem>>, vector<1x8x32xf32>
    tpu.vector_store %arg10[%c0_39, %c0_40, %c0_41], %152 {strides = array<i32>} : memref<1x8x32xf32, #tpu.memory_space<vmem>>, vector<1x8x32xf32>,
    return
  }
  func.func @transform_0(%arg0: i32) -> (i32, i32, i32) {
    %c0_i32 = arith.constant 0 : i32
    %c0_i32_0 = arith.constant 0 : i32
    %c0_i32_1 = arith.constant 0 : i32
    return %arg0, %c0_i32, %c0_i32_0 : i32, i32, i32
  }
  func.func @transform_1(%arg0: i32) -> (i32, i32) {
    %c0_i32 = arith.constant 0 : i32
    %c0_i32_0 = arith.constant 0 : i32
    %c0_i32_1 = arith.constant 0 : i32
    return %c0_i32, %c0_i32_0 : i32, i32
  }
  func.func @transform_2(%arg0: i32) -> (i32, i32) {
    %c0_i32 = arith.constant 0 : i32
    %c0_i32_0 = arith.constant 0 : i32
    %c0_i32_1 = arith.constant 0 : i32
    return %c0_i32, %c0_i32_0 : i32, i32
  }
  func.func @transform_3(%arg0: i32) -> (i32, i32) {
    %c0_i32 = arith.constant 0 : i32
    %c0_i32_0 = arith.constant 0 : i32
    %c0_i32_1 = arith.constant 0 : i32
    return %c0_i32, %c0_i32_0 : i32, i32
  }
  func.func @transform_4(%arg0: i32) -> (i32, i32) {
    %c0_i32 = arith.constant 0 : i32
    %c0_i32_0 = arith.constant 0 : i32
    %c0_i32_1 = arith.constant 0 : i32
    return %c0_i32, %c0_i32_0 : i32, i32
  }
  func.func @transform_5(%arg0: i32) -> (i32, i32) {
    %c0_i32 = arith.constant 0 : i32
    %c0_i32_0 = arith.constant 0 : i32
    %c0_i32_1 = arith.constant 0 : i32
    return %c0_i32, %c0_i32_0 : i32, i32
  }
  func.func @transform_6(%arg0: i32) -> (i32, i32) {
    %c0_i32 = arith.constant 0 : i32
    %c0_i32_0 = arith.constant 0 : i32
    %c0_i32_1 = arith.constant 0 : i32
    return %c0_i32, %c0_i32_0 : i32, i32
  }
  func.func @transform_7(%arg0: i32) -> (i32, i32) {
    %c0_i32 = arith.constant 0 : i32
    %c0_i32_0 = arith.constant 0 : i32
    %c0_i32_1 = arith.constant 0 : i32
    return %c0_i32, %c0_i32_0 : i32, i32
  }
  func.func @transform_8(%arg0: i32) -> (i32, i32) {
    %c0_i32 = arith.constant 0 : i32
    %c0_i32_0 = arith.constant 0 : i32
    %c0_i32_1 = arith.constant 0 : i32
    return %c0_i32, %c0_i32_0 : i32, i32
  }
  func.func @transform_9(%arg0: i32) -> (i32, i32, i32) {
    %c0_i32 = arith.constant 0 : i32
    %c0_i32_0 = arith.constant 0 : i32
    %c0_i32_1 = arith.constant 0 : i32
    return %arg0, %c0_i32, %c0_i32_0 : i32, i32, i32
  }
}

</mosaic_0001>

<bundles_post_ra>
// kernel: tpu_custom_call.1
= control target key start
LH: loop header
LB: loop body
LE: loop exit
PB: predicated region body
PF: predicated region fallthrough
CT: control target
= control target key end

     0   :  { %14 = vsyncpa [#allocation3], 0  ;;  %s3066_s0 = inlined_call_operand.hbm [shape: f32[2,8,32], index: 0, kind: input, shape index: {}]   ;;  %s3067_s1 = inlined_call_operand.hbm [shape: f32[32,96], index: 1, kind: input, shape index: {}]   ;;  %s3068_s2 = inlined_call_operand.vmem [shape: f32[1,96], index: 2, kind: input, shape index: {}]   ;;  %s3069_s3 = inlined_call_operand.hbm [shape: f32[32,32], index: 3, kind: input, shape index: {}]   ;;  %s3070_s4 = inlined_call_operand.vmem [shape: f32[1,32], index: 4, kind: input, shape index: {}]   ;;  %s3071_s5 = inlined_call_operand.vmem [shape: f32[1,32], index: 5, kind: input, shape index: {}]   ;;  %s3072_s6 = inlined_call_operand.vmem [shape: f32[1,32], index: 6, kind: input, shape index: {}]   ;;  %s3073_s7 = inlined_call_operand.vmem [shape: f32[1,32], index: 7, kind: input, shape index: {}]   ;;  %s3074_s8 = inlined_call_operand.vmem [shape: f32[1,32], index: 8, kind: input, shape index: {}]   ;;  %s3075_s9 = inlined_call_operand.hbm [shape: f32[2,8,32], index: 9, kind: output, shape index: {}]  }
   0x1   :  { %16 = vsyncpa [#allocation3 + $0x1], 0 }
   0x2   :  { %17 = vsyncpa [#allocation6], 0 }
   0x3   :  { %18 = vsyncpa [#allocation4], 0 }
   0x4   :  { %20 = vsyncpa [#allocation4 + $0x1], 0  ;;  %s2639_s30 = smov 0   ;;  %s2641_s10 = smov 0  }
   0x5   :  { %s2643_s11 = smov 0   ;;  %s2645_s12 = smov 0  }
   0x6 LB: > { %s2660_s13 = sadd.s32 4294967295, %s2562_s12   ;;  %s2078_s14 = sadd.s32 4294967294, %s2562_s12   ;;  %s2562_s12 = sphi %s2645_s12, %s3098_s12   ;;  %s2558_s11 = sphi %s2643_s11, %s3097_s11   ;;  %s2554_s10 = sphi %s2641_s10, %s3096_s10   ;;  %s2550_s30 = sphi %s2639_s30, %s3095_s30  }
   0x7   : > { %p46_p0 = scmp.ne.s32.totalorder %s2554_s10, %s2550_s30  ;;  %p3076_p1 = scmp.eq.s32.totalorder %s2660_s13, 0 }
   0x8   : > { %p244_p3 = scmp.eq.s32.totalorder %s2078_s14, 1  ;;  %p2079_p5 = scmp.ge.s32.totalorder %s2562_s12, 1 }
   0x9   : > { %p2669_p4 = por %p3076_p1, %p46_p0  ;;  %p251_p7 = scmp.lt.s32.totalorder %s2562_s12, 3 }
   0xa   : > { %p2674_p6 = por %p244_p3, %p46_p0  ;;  %s2564_s18 = smov [#allocation5]  }
   0xb   : > { %s3080_s15 = scalar_select %p2669_p4, 1, 0 }
   0xc   : > { %s3081_s16 = scalar_select %p2674_p6, 1, 0 }
   0xd   : > { %p2679_p8 = pnand %p2079_p5, %p251_p7  ;;  %s263_s19 = sshll.u32 %s2564_s18, 4  ;;  %s2683_s19 = int_to_ptr.vmem [resolvable:$true] %s263_s19 }
   0xe   : > { %3082 = sst [smem:[#allocation12_spill]] %s3081_s16  ;;  %s2565_s21 = smov [#allocation7]  }
   0xf   : > { %p2294_p9 = pneg %p2679_p8  ;;  %s279_s22 = sshll.u32 %s2565_s21, 4  ;;  %s2694_s22 = int_to_ptr.vmem [resolvable:$true] %s279_s22 }
  0x10   : > { %s2406_s25 = scalar_lea.hbm %s3067_s1, 512 }
  0x11   : > { %p2690_p11 = pnand %p2294_p9, %p3076_p1  ;;  %p2407_p12 = scmp.ne.s32.totalorder %s3067_s1, %s2406_s25 }
  0x12   : > { %p2413_p5 = scmp.lt.u32.totalorder %s2406_s25, %s3067_s1 }
  0x13   : > { %p2408_p13 = pneg %p2690_p11 }
  0x15   : > { %p2409_p0 = pnand %p2408_p13, %p2407_p12 }
  0x17   : > { %p2410_p3 = pneg %p2409_p0 }
  0x19   : > { %p2415_p7 = pnand %p2413_p5, %p2410_p3 }
  0x1b   : > { %2418 = shalt.err (!%p2415_p7)
}
  0x1c   : > { %s2419_s14 = scalar_lea.vmem %s2683_s19, 512  ;;  %p2427_p2 = scmp.lt.s32.totalorder %s2683_s19, %s2683_s19 }
  0x1d   : > { %p2420_p9 = scmp.ne.s32.totalorder %s2683_s19, %s2419_s14  ;;  %p2428_p12 = scmp.lt.s32.totalorder %s2419_s14, %s2419_s14 }
  0x1f   : > { %p2422_p10 = pnand %p2420_p9, %p2408_p13  ;;  %p2429_p0 = por %p2428_p12, %p2427_p2 }
  0x21   : > { %p2423_p1 = pneg %p2422_p10 }
  0x23   : > { %p2430_p6 = pnand %p2429_p0, %p2423_p1 }
  0x25   : > { %2433 = shalt.err (!%p2430_p6)
}
  0x26   : > { %s2566_s18 = smov 128   ;;  %s2567_s21 = smov 8  }
  0x27   : > { %2297 = dma.hbm_to_vmem [thread:$0]  (!%p2690_p11), %s3067_s1, 512, %s2683_s19, [#allocation6], %s2566_s18, %s2566_s18, %s2567_s21  }
  0x28   : > { %s2434_s27 = scalar_lea.hbm %s3069_s3, 512 }
  0x29   : > { %p2435_p2 = scmp.ne.s32.totalorder %s3069_s3, %s2434_s27  ;;  %p2441_p10 = scmp.lt.u32.totalorder %s2434_s27, %s3069_s3 }
  0x2b   : > { %p2437_p1 = pnand %p2435_p2, %p2408_p13 }
  0x2d   : > { %p2438_p6 = pneg %p2437_p1 }
  0x2f   : > { %p2443_p3 = pnand %p2441_p10, %p2438_p6 }
  0x31   : > { %2446 = shalt.err (!%p2443_p3)
}
  0x32   : > { %s2447_s19 = scalar_lea.vmem %s2694_s22, 512  ;;  %p2455_p12 = scmp.lt.s32.totalorder %s2694_s22, %s2694_s22 }
  0x33   : > { %p2448_p5 = scmp.ne.s32.totalorder %s2694_s22, %s2447_s19  ;;  %p2456_p0 = scmp.lt.s32.totalorder %s2447_s19, %s2447_s19 }
  0x35   : > { %p2450_p7 = pnand %p2448_p5, %p2408_p13  ;;  %p2457_p2 = por %p2456_p0, %p2455_p12 }
  0x37   : > { %p2451_p9 = pneg %p2450_p7 }
  0x39   : > { %p2458_p1 = pnand %p2457_p2, %p2451_p9 }
  0x3b   : > { %2461 = shalt.err (!%p2458_p1)
}
  0x3c   : > { %2300 = dma.hbm_to_vmem [thread:$0]  (!%p2690_p11), %s3069_s3, 512, %s2694_s22, [#allocation6], %s2566_s18, %s2566_s18, %s2567_s21  }
  0x3d   : > { %s2749_s24 = sadd.s32 1, %s2562_s12   ;;  %s33_s20 = sadd.s32 1, %s2558_s11 }
  0x3e   : > { %s30_s25 = ssub.s32 %s2562_s12, %s2749_s24  ;;  %p40_p13 = scmp.ne.s32.totalorder %s2558_s11, %s2554_s10 }
  0x3f   : > { %p31_p6 = scmp.eq.s32.totalorder %s30_s25, 0  ;;  %p41_p10 = scmp.eq.s32.totalorder %s2562_s12, 0 }
  0x40   : > { %p3085_p3 = scmp.eq.s32.totalorder %s2660_s13, 1  ;;  %p2311_p7 = scmp.lt.s32.totalorder %s2562_s12, 2 }
  0x41   : > { %s2765_s27 = scalar_select %p31_p6, %s2558_s11, %s33_s20  }
  0x42   : > { %p2759_p5 = por %p3085_p3, %p40_p13  ;;  %p42_p9 = por %p41_p10, %p40_p13 }
  0x43   : > { %s308_s28 = sand.u32 1, %s2558_s11   ;;  %s2084_s22 = sshll.u32 %s2562_s12, 7 }
  0x44   : > { %s3086_s26 = scalar_select %p2759_p5, 1, 0 }
  0x45   : > { %s2083_s29 = sshll.u32 %s308_s28, 3  ;;  %s2772_s14 = scalar_lea.hbm %s3066_s0, %s2084_s22 }
  0x46   : > { %s312_s19 = scalar_lea.vmem [#allocation2], %s2083_s29  ;;  %p2776_p11 = pnand %p2311_p7, %p42_p9 }
  0x47   : > { %s319_s16 = sshll.u32 %s312_s19, 4  ;;  %s309_s20 = scalar_lea.sflag [#allocation3], %s308_s28  ;;  %s2774_s16 = int_to_ptr.vmem [resolvable:$true] %s319_s16 }
  0x48   : > { %s2462_s25 = scalar_lea.hbm %s2772_s14, 128  ;;  %p2464_p0 = pneg %p2776_p11 }
  0x49   : > { %p2463_p12 = scmp.ne.s32.totalorder %s2772_s14, %s2462_s25  ;;  %s2467_s18 = scalar_lea.hbm %s3066_s0, 256 }
  0x4a   : > { %p2468_p13 = scmp.lt.u32.totalorder %s2772_s14, %s3066_s0  ;;  %p2469_p6 = scmp.lt.u32.totalorder %s2467_s18, %s2462_s25 }
  0x4b   : > { %p2465_p2 = pnand %p2464_p0, %p2463_p12  ;;  %p2471_p3 = scmp.lt.u32.totalorder %s2462_s25, %s2772_s14 }
  0x4c   : > { %p2470_p10 = por %p2469_p6, %p2468_p13 }
  0x4d   : > { %p2466_p1 = pneg %p2465_p2 }
  0x4e   : > { %p2472_p7 = por %p2471_p3, %p2470_p10 }
  0x50   : > { %p2473_p9 = pnand %p2472_p7, %p2466_p1 }
  0x52   : > { %2476 = shalt.err (!%p2473_p9)
}
  0x53   : > { %s2477_s28 = scalar_lea.vmem %s2774_s16, 128  ;;  %s2568_s22 = smov [#allocation2]  }
  0x54   : > { %p2478_p12 = scmp.ne.s32.totalorder %s2774_s16, %s2477_s28  ;;  %s2482_s29 = sshll.u32 %s2568_s22, 4  ;;  %s2483_s29 = int_to_ptr.vmem [resolvable:$false] %s2482_s29 }
  0x55   : > { %s2484_s21 = scalar_lea.vmem %s2483_s29, 256  ;;  %p2485_p4 = scmp.lt.s32.totalorder %s2774_s16, %s2483_s29 }
  0x56   : > { %p2480_p2 = pnand %p2478_p12, %p2464_p0  ;;  %p2486_p13 = scmp.lt.s32.totalorder %s2484_s21, %s2477_s28 }
  0x58   : > { %p2481_p5 = pneg %p2480_p2  ;;  %p2487_p6 = por %p2486_p13, %p2485_p4 }
  0x5a   : > { %p2488_p10 = pnand %p2487_p6, %p2481_p5 }
  0x5c   : > { %2491 = shalt.err (!%p2488_p10)
}
  0x5d   : > { %2304 = dma.hbm_to_vmem [thread:$0]  (!%p2776_p11), %s2772_s14, 128, %s2774_s16, %s309_s20  }
  0x5e   : > { %328 = sbr.rel (%p2679_p8) target bundleno = 2308 (0x904), region = 56  ;;  %s2808_s25 = sand.u32 (!%p2679_p8), 1, %s2554_s10  }
  0x5f   : > { %s2086_s18 = sshll.u32 (!%p2679_p8), %s2808_s25, 3  ;;  %s331_s19 = scalar_lea.sflag (!%p2679_p8), [#allocation3], %s2808_s25 }
  0x60   : > { %s334_s28 = scalar_lea.vmem (!%p2679_p8), [#allocation2], %s2086_s18  ;;  %p3088_p4 = scmp.ne.s32.totalorder (!%p2679_p8), %s3080_s15, 0 }
  0x65   : > { %2537 = dma.done.wait (%p3088_p4), %s331_s19, 128  }
  0x66   : > { %2539 = vsyncadd (%p3088_p4), %s331_s19, 4294967168  ;;  %p3089_p5 = scmp.eq.s32.totalorder %s2660_s13, 0 }
  0x68   : > { %2541 = dma.done.wait (%p3089_p5), [#allocation6], 1024   ;;  %p3090_p8 = pmov %p3089_p5 }
  0x69   : > { %v2569_v0 = vmov 0.0|0.0   ;;  %vm2570_vm0 = vmmov 0   ;;  %v2571_v1 = vmov 0.0   ;;  %v378_v2 = vld [vmem:[#allocation5] sm:$0xff]  ;;  %v379_v3 = vld [vmem:[#allocation5 + $0x8] sm:$0xff]  ;;  %v380_v4 = vld [vmem:[#allocation5 + $0x10] sm:$0xff] }
  0x6a   : > { %2543 = vsyncadd (%p3090_p8), [#allocation6], 4294966272  ;;  %2270 = vmatprep.subr.bf16.mxu0 %v2569_v0  ;;  %2176 = vmatprep.mubr.msk.f32.mxu0 %vm2570_vm0, %v2571_v1  ;;  %v2271_v5 = vpack.c.bf16 %v379_v3, %v378_v2  ;;  %v381_v6 = vld [vmem:[#allocation5 + $0x18] sm:$0xff]  ;;  %vm389_vm1 = vcmask 261120   ;;  %v2090_v9 = vld [vmem:[%s3068_s2] ss:$0 sm:$0xff] }
  0x6b   : > { %2179 = vmatprep.subr.mxu1 %v2571_v1  ;;  %2181 = vmatprep.mubr.msk.f32.mxu1 %vm2570_vm0, %v2571_v1  ;;  %v2274_v7 = vpack.c.bf16 %v381_v6, %v380_v4  ;;  %v2829_v8 = vld [vmem:[%s334_s28] sm:$0xff]  ;;  %s2572_s14 = smov 116   ;;  %s2573_s16 = smov 124   ;;  %vm480_vm2 = vcmask 31744   ;;  %vm1087_vm3 = vcmask 64512   ;;  %vm1814_vm4 = vcmask 97280  }
  0x6c   : > { %2272 = vmatpush3.bf16.msra.mxu0 %v2271_v5  ;;  %s2574_s23 = smov 112   ;;  %s2575_s20 = smov 120   ;;  %vm1816_vm5 = vcmask 130048   ;;  %vm1818_vm6 = vcmask 162816   ;;  %vm1820_vm7 = vcmask 195584   ;;  %vm1822_vm8 = vcmask 228352  }
  0x6d   : > { %2273 = vmatprep.subr.bf16.mxu0 %v2569_v0  ;;  %s2576_s22 = smov 104   ;;  %s2577_s29 = smov 108  }
  0x6e   : > { %s2578_s21 = smov 96   ;;  %s2579_s19 = smov 100  }
  0x6f   : > { %s2580_s28 = smov 64   ;;  %s2581_s15 = smov 4  }
  0x70   : > { %2275 = vmatpush3.bf16.msra.mxu0 %v2274_v7  ;;  %s2582_s17 = smov 12   ;;  %p3091_p0 = scmp.ne.s32.totalorder %s3086_s26, 0 }
  0x71   : > { %2199 = vmatprep.subr.mxu0 %v2571_v1 }
  0x73   : > { %2177 = vmatmul.mubr.msk.f32.vlgmr.msra.gmra.mrb[0].mxu0 %vm389_vm1, %v2829_v8 }
  0x74   : > { %2201 = vmatprep.mubr.msk.f32.mxu0 %vm2570_vm0, %v2571_v1 }
 0x146   : > { %v459_v10 = vpop.f32.mrb[0].mxu0 }
 0x147   : > { %v2839_v11 = vadd.f32 %v2090_v9, %v459_v10  ;;  %v2178_v12 = vpop.f32.mrb[1].mxu0 }
 0x149   : > { %468 = vrot.lane.b32.xlu1 %v2839_v11, %s2572_s14  ;;  %464 = vrot.lane.b32.xlu0 %v2839_v11, %s2573_s16  ;;  %s2583_s14 = smov 20   ;;  %s2584_s16 = smov 8  }
 0x14d   : > { %470 = vrot.lane.b32.xlu1 %v2839_v11, %s2574_s23  ;;  %466 = vrot.lane.b32.xlu0 %v2839_v11, %s2575_s20  ;;  %s2585_s23 = smov 28   ;;  %s2586_s20 = smov 16  }
 0x151   : > { %474 = vrot.lane.b32.xlu1 %v2839_v11, %s2576_s22  ;;  %472 = vrot.lane.b32.xlu0 %v2839_v11, %s2577_s29  ;;  %s2587_s22 = smov 24   ;;  %s376_s29 = scalar_lea.vmem [#allocation8], %s2086_s18 }
 0x155   : > { %478 = vrot.lane.b32.xlu1 %v2839_v11, %s2578_s21  ;;  %476 = vrot.lane.b32.xlu0 %v2839_v11, %s2579_s19 }
 0x1bb   : > { %v2849_v13 = vpop.permute.xlu1 %468  ;;  %v2851_v14 = vpop.permute.xlu0 %464 }
 0x1bc   : > { %555 = vrot.lane.b32.xlu0 %v2851_v14, %s2578_s21 }
 0x1bf   : > { %v2854_v15 = vpop.permute.xlu1 %470  ;;  %v2856_v16 = vpop.permute.xlu0 %466 }
 0x1c0   : > { %707 = vrot.lane.b32.xlu0 %v2849_v13, %s2578_s21  ;;  %631 = vrot.lane.b32.xlu1 %v2856_v16, %s2578_s21 }
 0x1c3   : > { %v2860_v17 = vpop.permute.xlu1 %474  ;;  %v2862_v18 = vpop.permute.xlu0 %472 }
 0x1c4   : > { %783 = vrot.lane.b32.xlu1 %v2854_v15, %s2578_s21  ;;  %859 = vrot.lane.b32.xlu0 %v2862_v18, %s2578_s21 }
 0x1c7   : > { %v479_v19 = vpop.permute.xlu1 %478  ;;  %v2866_v20 = vpop.permute.xlu0 %476 }
 0x1c8   : > { %2180 = vmatpush3.xpose.msk.msra.mxu1 %vm480_vm2, %v479_v19  ;;  %935 = vrot.lane.b32.xlu1 %v2860_v17, %s2578_s21 }
 0x1c9   : > { %1011 = vrot.lane.b32.xlu0 %v2866_v20, %s2578_s21  ;;  %2184 = vmatprep.subr.mxu1 %v2571_v1  ;;  %s1989_s21 = sshll.u32 %s376_s29, 4  ;;  %s3023_s21 = int_to_ptr.vmem [resolvable:$true] %s1989_s21 }
 0x1cb   : > { %2182 = vmatmul.mubr.msk.f32.vlgmr.msra.gmra.mrb[0].mxu1 %vm480_vm2, %v2839_v11 }
 0x1cc   : > { %2186 = vmatprep.mubr.msk.f32.mxu1 %vm2570_vm0, %v2571_v1 }
 0x22e   : > { %v556_v21 = vpop.permute.xlu0 %555 }
 0x22f   : > { %2185 = vmatpush3.xpose.msk.msra.mxu1 %vm480_vm2, %v556_v21 }
 0x230   : > { %2189 = vmatprep.subr.mxu1 %v2571_v1 }
 0x232   : > { %v632_v22 = vpop.permute.xlu1 %631  ;;  %2187 = vmatmul.mubr.msk.f32.vlgmr.msra.gmra.mrb[2].mxu1 %vm480_vm2, %v2851_v14  ;;  %v708_v23 = vpop.permute.xlu0 %707 }
 0x233   : > { %2190 = vmatpush3.xpose.msk.msra.mxu1 %vm480_vm2, %v632_v22  ;;  %2191 = vmatprep.mubr.msk.f32.mxu1 %vm2570_vm0, %v2571_v1 }
 0x234   : > { %2194 = vmatprep.subr.mxu1 %v2571_v1 }
 0x236   : > { %v784_v24 = vpop.permute.xlu1 %783  ;;  %2192 = vmatmul.mubr.msk.f32.vlgmr.msra.gmra.mrb[4].mxu1 %vm480_vm2, %v2856_v16  ;;  %v860_v25 = vpop.permute.xlu0 %859 }
 0x237   : > { %2195 = vmatpush3.xpose.msk.msra.mxu1 %vm480_vm2, %v708_v23  ;;  %2200 = vmatpush3.xpose.msk.msra.mxu0 %vm480_vm2, %v784_v24 }
 0x238   : > { %2196 = vmatprep.mubr.msk.f32.mxu1 %vm2570_vm0, %v2571_v1  ;;  %2209 = vmatprep.subr.mxu0 %v2571_v1 }
 0x239   : > { %2204 = vmatprep.subr.mxu1 %v2571_v1 }
 0x23a   : > { %2202 = vmatmul.mubr.msk.f32.vlgmr.msra.gmra.mrb[2].mxu0 %vm480_vm2, %v2854_v15  ;;  %v936_v26 = vpop.permute.xlu1 %935  ;;  %2197 = vmatmul.mubr.msk.f32.vlgmr.msra.gmra.mrb[6].mxu1 %vm480_vm2, %v2849_v13 }
 0x23b   : > { %2205 = vmatpush3.xpose.msk.msra.mxu1 %vm480_vm2, %v860_v25  ;;  %2210 = vmatpush3.xpose.msk.msra.mxu0 %vm480_vm2, %v936_v26  ;;  %v1012_v27 = vpop.permute.xlu0 %1011 }
 0x23c   : > { %2206 = vmatprep.mubr.msk.f32.mxu1 %vm2570_vm0, %v2571_v1  ;;  %2211 = vmatprep.mubr.msk.f32.mxu0 %vm2570_vm0, %v2571_v1 }
 0x23d   : > { %2214 = vmatprep.subr.mxu1 %v2571_v1  ;;  %2219 = vmatprep.subr.mxu0 %v2571_v1 }
 0x23e   : > { %2207 = vmatmul.mubr.msk.f32.vlgmr.msra.gmra.mrb[8].mxu1 %vm480_vm2, %v2862_v18  ;;  %2212 = vmatmul.mubr.msk.f32.vlgmr.msra.gmra.mrb[4].mxu0 %vm480_vm2, %v2860_v17 }
 0x23f   : > { %2215 = vmatpush3.xpose.msk.msra.mxu1 %vm480_vm2, %v1012_v27  ;;  %2216 = vmatprep.mubr.msk.f32.mxu1 %vm2570_vm0, %v2571_v1 }
 0x240   : > { %2224 = vmatprep.subr.mxu1 %v2571_v1  ;;  %2221 = vmatprep.mubr.msk.f32.mxu0 %vm2570_vm0, %v2571_v1 }
 0x242   : > { %2217 = vmatmul.mubr.msk.f32.vlgmr.msra.gmra.mrb[10].mxu1 %vm480_vm2, %v2866_v20 }
 0x243   : > { %2226 = vmatprep.mubr.msk.f32.mxu1 %vm2570_vm0, %v2571_v1 }
 0x29e   : > { %v551_v28 = vpop.f32.mrb[0].mxu1 }
 0x29f   : > { %v2183_v29 = vpop.f32.mrb[1].mxu1  ;;  %v1088_v30 = vsel %vm1087_vm3, %v551_v28, -inf }
 0x2a0   : > { %1089 = vmax.xlane.f32.xlu1 %v1088_v30 }
 0x305   : > { %v627_v31 = vpop.f32.mrb[2].mxu1 }
 0x306   : > { %v2188_v32 = vpop.f32.mrb[3].mxu1  ;;  %v1091_v33 = vsel %vm1087_vm3, %v627_v31, -inf }
 0x307   : > { %1092 = vmax.xlane.f32.xlu0 %v1091_v33 }
 0x309   : > { %v703_v34 = vpop.f32.mrb[4].mxu1 }
 0x30a   : > { %v2193_v35 = vpop.f32.mrb[5].mxu1  ;;  %v1094_v36 = vsel %vm1087_vm3, %v703_v34, -inf }
 0x30b   : > { %1095 = vmax.xlane.f32.xlu0 %v1094_v36 }
 0x30d   : > { %v779_v37 = vpop.f32.mrb[6].mxu1  ;;  %v855_v38 = vpop.f32.mrb[2].mxu0 }
 0x30e   : > { %v2198_v39 = vpop.f32.mrb[7].mxu1  ;;  %v2203_v40 = vpop.f32.mrb[3].mxu0  ;;  %v1097_v41 = vsel %vm1087_vm3, %v779_v37, -inf  ;;  %v1100_v42 = vsel %vm1087_vm3, %v855_v38, -inf }
 0x30f   : > { %1098 = vmax.xlane.f32.xlu1 %v1097_v41  ;;  %1101 = vmax.xlane.f32.xlu0 %v1100_v42 }
 0x311   : > { %v931_v43 = vpop.f32.mrb[8].mxu1  ;;  %v1007_v44 = vpop.f32.mrb[4].mxu0 }
 0x312   : > { %v2208_v45 = vpop.f32.mrb[9].mxu1  ;;  %v2213_v46 = vpop.f32.mrb[5].mxu0  ;;  %v1103_v47 = vsel %vm1087_vm3, %v931_v43, -inf  ;;  %v1106_v48 = vsel %vm1087_vm3, %v1007_v44, -inf }
 0x313   : > { %1104 = vmax.xlane.f32.xlu1 %v1103_v47  ;;  %1107 = vmax.xlane.f32.xlu0 %v1106_v48 }
 0x315   : > { %v1083_v49 = vpop.f32.mrb[10].mxu1 }
 0x316   : > { %v2218_v50 = vpop.f32.mrb[11].mxu1  ;;  %v1109_v51 = vsel %vm1087_vm3, %v1083_v49, -inf }
 0x317   : > { %1110 = vmax.xlane.f32.xlu1 %v1109_v51 }
 0x328   : > { %1252 = vrot.lane.b32.xlu1 %v2851_v14, %s2580_s28 }
 0x329   : > { %1176 = vrot.lane.b32.xlu0 %v2839_v11, %s2580_s28 }
 0x32c   : > { %1328 = vrot.lane.b32.xlu1 %v2856_v16, %s2580_s28 }
 0x32d   : > { %1404 = vrot.lane.b32.xlu0 %v2849_v13, %s2580_s28  ;;  %v1090_v52 = vpop.xlane.xlu1 %1089 }
 0x32e   : > { %v1112_v53 = vsub.f32 %v551_v28, %v1090_v52 }
 0x330   : > { %1480 = vrot.lane.b32.xlu1 %v2854_v15, %s2580_s28  ;;  %v1120_v54 = vmul.f32 1.442695, %v1112_v53 }
 0x331   : > { %1556 = vrot.lane.b32.xlu0 %v2862_v18, %s2580_s28 }
 0x332   : > { %2370 = vpow2.f32 %v1120_v54 }
 0x33c   : > { %v2938_v55 = vpop.eup %2370 }
 0x33d   : > { %v1136_v56 = vsel %vm1087_vm3, %v2938_v55, 0.0 }
 0x350   : > { %1137 = vadd.xlane.f32.xlu0 %v1136_v56 }
 0x394   : > { %v1093_v57 = vpop.xlane.xlu0 %1092 }
 0x395   : > { %v1113_v58 = vsub.f32 %v627_v31, %v1093_v57 }
 0x397   : > { %v1122_v59 = vmul.f32 1.442695, %v1113_v58 }
 0x398   : > { %v1096_v60 = vpop.xlane.xlu0 %1095 }
 0x399   : > { %2372 = vpow2.f32 %v1122_v59  ;;  %v1114_v61 = vsub.f32 %v703_v34, %v1096_v60 }
 0x39b   : > { %v1124_v6 = vmul.f32 1.442695, %v1114_v61 }
 0x39c   : > { %v1099_v62 = vpop.xlane.xlu1 %1098  ;;  %v1102_v63 = vpop.xlane.xlu0 %1101 }
 0x39d   : > { %v1115_v2 = vsub.f32 %v779_v37, %v1099_v62  ;;  %v1116_v3 = vsub.f32 %v855_v38, %v1102_v63 }
 0x39f   : > { %v1126_v4 = vmul.f32 1.442695, %v1115_v2  ;;  %v1128_v5 = vmul.f32 1.442695, %v1116_v3 }
 0x3a0   : > { %v1105_v7 = vpop.xlane.xlu1 %1104  ;;  %v1108_v9 = vpop.xlane.xlu0 %1107 }
 0x3a1   : > { %2374 = vpow2.f32 %v1126_v4  ;;  %v1117_v10 = vsub.f32 %v931_v43, %v1105_v7  ;;  %v1118_v11 = vsub.f32 %v1007_v44, %v1108_v9 }
 0x3a2   : > { %2376 = vpow2.f32 %v1128_v5 }
 0x3a3   : > { %v2373_v12 = vpop.eup %2372  ;;  %v1130_v13 = vmul.f32 1.442695, %v1117_v10  ;;  %2378 = vpow2.f32 %v1124_v6  ;;  %v1132_v14 = vmul.f32 1.442695, %v1118_v11 }
 0x3a4   : > { %v1111_v15 = vpop.xlane.xlu1 %1110  ;;  %v1177_v16 = vpop.permute.xlu0 %1176  ;;  %v1139_v18 = vsel %vm1087_vm3, %v2373_v12, 0.0 }
 0x3a5   : > { %2380 = vpow2.f32 %v1130_v13  ;;  %v1119_v19 = vsub.f32 %v1083_v49, %v1111_v15  ;;  %1140 = vadd.xlane.f32.xlu1 %v1139_v18  ;;  %2220 = vmatpush3.msra.mxu0 %v1177_v16 }
 0x3a6   : > { %2229 = vmatprep.subr.mxu0 %v2571_v1  ;;  %2382 = vpow2.f32 %v1132_v14 }
 0x3a7   : > { %v1134_v21 = vmul.f32 1.442695, %v1119_v19 }
 0x3a8   : > { %v1253_v22 = vpop.permute.xlu1 %1252  ;;  %v1405_v35 = vpop.permute.xlu0 %1404 }
 0x3a9   : > { %2384 = vpow2.f32 %v1134_v21  ;;  %2225 = vmatpush3.msra.mxu1 %v1253_v22 }
 0x3aa   : > { %2234 = vmatprep.subr.mxu1 %v2571_v1 }
 0x3ab   : > { %v2375_v23 = vpop.eup %2374 }
 0x3ac   : > { %v2945_v24 = vpop.eup %2376  ;;  %v1145_v25 = vsel %vm1087_vm3, %v2375_v23, 0.0  ;;  %v1557_v36 = vpop.permute.xlu0 %1556 }
 0x3ad   : > { %1146 = vadd.xlane.f32.xlu1 %v1145_v25  ;;  %v1148_v26 = vsel %vm1087_vm3, %v2945_v24, 0.0  ;;  %v2379_v27 = vpop.eup %2378  ;;  %v1329_v40 = vpop.permute.xlu1 %1328 }
 0x3ae   : > { %1149 = vadd.xlane.f32.xlu0 %v1148_v26  ;;  %v1142_v30 = vsel %vm1087_vm3, %v2379_v27, 0.0 }
 0x3af   : > { %v2381_v28 = vpop.eup %2380 }
 0x3b0   : > { %v1151_v29 = vsel %vm1087_vm3, %v2381_v28, 0.0  ;;  %v2952_v31 = vpop.eup %2382 }
 0x3b1   : > { %1152 = vadd.xlane.f32.xlu1 %v1151_v29  ;;  %v1154_v34 = vsel %vm1087_vm3, %v2952_v31, 0.0 }
 0x3b2   : > { %1143 = vadd.xlane.f32.xlu0 %v1142_v30 }
 0x3b3   : > { %v2385_v32 = vpop.eup %2384 }
 0x3b4   : > { %v1157_v33 = vsel %vm1087_vm3, %v2385_v32, 0.0 }
 0x3b5   : > { %1158 = vadd.xlane.f32.xlu1 %v1157_v33 }
 0x3b6   : > { %1155 = vadd.xlane.f32.xlu0 %v1154_v34 }
 0x3c6   : > { %1632 = vrot.lane.b32.xlu1 %v2860_v17, %s2580_s28  ;;  %v1481_v17 = vpop.permute.xlu1 %1480 }
 0x3cc   : > { %1708 = vrot.lane.b32.xlu0 %v2866_v20, %s2580_s28 }
 0x3dd   : > { %v1138_v37 = vpop.xlane.xlu0 %1137 }
 0x3de   : > { %2386 = vrcp.f32 %v1138_v37 }
 0x3e8   : > { %v2387_v38 = vpop.eup %2386 }
 0x3e9   : > { %v1161_v39 = vmul.f32 %v2387_v38, %v2938_v55 }
 0x3eb   : > { %2222 = vmatmul.mubr.msk.f32.vlgmr.msra.gmra.mrb[6].mxu0 %vm1087_vm3, %v1161_v39  ;;  %v1857_v39 = vld [vmem:[#allocation7] sm:$0xff] }
 0x3ec   : > { %2230 = vmatpush3.msra.mxu0 %v1329_v40  ;;  %2231 = vmatprep.mubr.msk.f32.mxu0 %vm2570_vm0, %v2571_v1  ;;  %v1858_v40 = vld [vmem:[#allocation7 + $0x8] sm:$0xff] }
 0x3ed   : > { %2239 = vmatprep.subr.mxu0 %v2571_v1 }
 0x432   : > { %v1141_v41 = vpop.xlane.xlu1 %1140 }
 0x433   : > { %2388 = vrcp.f32 %v1141_v41  ;;  %v2277_v41 = vpack.c.bf16 %v1858_v40, %v1857_v39 }
 0x43a   : > { %v1147_v20 = vpop.xlane.xlu1 %1146 }
 0x43b   : > { %2390 = vrcp.f32 %v1147_v20  ;;  %v1150_v42 = vpop.xlane.xlu0 %1149  ;;  %v1860_v20 = vld [vmem:[#allocation7 + $0x18] sm:$0xff] }
 0x43d   : > { %v2389_v43 = vpop.eup %2388 }
 0x43e   : > { %v1163_v44 = vmul.f32 %v2389_v43, %v2373_v12  ;;  %v1153_v45 = vpop.xlane.xlu1 %1152 }
 0x43f   : > { %2392 = vrcp.f32 %v1153_v45  ;;  %v1144_v46 = vpop.xlane.xlu0 %1143 }
 0x440   : > { %2394 = vrcp.f32 %v1144_v46  ;;  %2227 = vmatmul.mubr.msk.f32.vlgmr.msra.gmra.mrb[12].mxu1 %vm1087_vm3, %v1163_v44 }
 0x441   : > { %2235 = vmatpush3.msra.mxu1 %v1405_v35  ;;  %2236 = vmatprep.mubr.msk.f32.mxu1 %vm2570_vm0, %v2571_v1  ;;  %2396 = vrcp.f32 %v1150_v42 }
 0x442   : > { %v1159_v47 = vpop.xlane.xlu1 %1158  ;;  %2244 = vmatprep.subr.mxu1 %v2571_v1 }
 0x443   : > { %2398 = vrcp.f32 %v1159_v47  ;;  %v1156_v48 = vpop.xlane.xlu0 %1155 }
 0x444   : > { %2400 = vrcp.f32 %v1156_v48  ;;  %v2116_v48 = vld [vmem:[%s3071_s5] ss:$0 sm:$0xff] }
 0x445   : > { %v2391_v49 = vpop.eup %2390 }
 0x446   : > { %v1167_v50 = vmul.f32 %v2391_v49, %v2375_v23  ;;  %v1633_v61 = vpop.permute.xlu1 %1632 }
 0x447   : > { %v1709_v56 = vpop.permute.xlu0 %1708 }
 0x448   : > { %2237 = vmatmul.mubr.msk.f32.vlgmr.msra.gmra.mrb[14].mxu1 %vm1087_vm3, %v1167_v50  ;;  %v2117_v50 = vld [vmem:[%s3072_s6] ss:$0 sm:$0xff] }
 0x449   : > { %v2393_v51 = vpop.eup %2392  ;;  %2245 = vmatpush3.msra.mxu1 %v1557_v36  ;;  %2246 = vmatprep.mubr.msk.f32.mxu1 %vm2570_vm0, %v2571_v1 }
 0x44a   : > { %v2395_v52 = vpop.eup %2394  ;;  %v1171_v53 = vmul.f32 %v2393_v51, %v2381_v28  ;;  %2254 = vmatprep.subr.mxu1 %v2571_v1 }
 0x44b   : > { %v1165_v54 = vmul.f32 %v2395_v52, %v2379_v27  ;;  %v2397_v55 = vpop.eup %2396 }
 0x44c   : > { %2247 = vmatmul.mubr.msk.f32.vlgmr.msra.gmra.mrb[16].mxu1 %vm1087_vm3, %v1171_v53  ;;  %v1169_v59 = vmul.f32 %v2397_v55, %v2945_v24  ;;  %v2118_v55 = vld [vmem:[%s3070_s4] ss:$0 sm:$0xff] }
 0x44d   : > { %v2399_v57 = vpop.eup %2398  ;;  %2232 = vmatmul.mubr.msk.f32.vlgmr.msra.gmra.mrb[8].mxu0 %vm1087_vm3, %v1165_v54  ;;  %2255 = vmatpush3.msra.mxu1 %v1709_v56 }
 0x44e   : > { %v1175_v58 = vmul.f32 %v2399_v57, %v2385_v32  ;;  %2240 = vmatpush3.msra.mxu0 %v1481_v17  ;;  %2241 = vmatprep.mubr.msk.f32.mxu0 %vm2570_vm0, %v2571_v1  ;;  %v2401_v60 = vpop.eup %2400  ;;  %v1859_v17 = vld [vmem:[#allocation7 + $0x10] sm:$0xff] }
 0x44f   : > { %2249 = vmatprep.subr.mxu0 %v2571_v1  ;;  %2256 = vmatprep.mubr.msk.f32.mxu1 %vm2570_vm0, %v2571_v1  ;;  %v1173_v62 = vmul.f32 %v2401_v60, %v2952_v31  ;;  %v2280_v42 = vpack.c.bf16 %v1860_v20, %v1859_v17 }
 0x450   : > { %2257 = vmatmul.mubr.msk.f32.vlgmr.msra.gmra.mrb[18].mxu1 %vm1087_vm3, %v1175_v58 }
 0x451   : > { %2242 = vmatmul.mubr.msk.f32.vlgmr.msra.gmra.mrb[10].mxu0 %vm1087_vm3, %v1169_v59 }
 0x452   : > { %2250 = vmatpush3.msra.mxu0 %v1633_v61  ;;  %2251 = vmatprep.mubr.msk.f32.mxu0 %vm2570_vm0, %v2571_v1 }
 0x453   : > { %2276 = vmatprep.subr.bf16.mxu0 %v2569_v0 }
 0x455   : > { %2252 = vmatmul.mubr.msk.f32.vlgmr.msra.gmra.mrb[12].mxu0 %vm1087_vm3, %v1173_v62 }
 0x456   : > { %2267 = vmatprep.mubr.msk.f32.mxu0 %vm2570_vm0, %v2571_v1  ;;  %2278 = vmatpush3.bf16.msra.mxu0 %v2277_v41 }
 0x457   : > { %2279 = vmatprep.subr.bf16.mxu0 %v2569_v0 }
 0x45a   : > { %2281 = vmatpush3.bf16.msra.mxu0 %v2280_v42 }
 0x4be   : > { %v1248_v63 = vpop.f32.mrb[6].mxu0 }
 0x4bf   : > { %v2223_v2 = vpop.f32.mrb[7].mxu0 }
 0x513   : > { %v1324_v3 = vpop.f32.mrb[12].mxu1 }
 0x514   : > { %1785 = vrot.lane.b32.xlu1 %v1324_v3, %s2581_s15  ;;  %v2228_v4 = vpop.f32.mrb[13].mxu1 }
 0x51b   : > { %v1476_v5 = vpop.f32.mrb[14].mxu1 }
 0x51c   : > { %1793 = vrot.lane.b32.xlu1 %v1476_v5, %s2582_s17  ;;  %v2238_v6 = vpop.f32.mrb[15].mxu1  ;;  %s1976_s17 = scalar_lea.sflag [#allocation4], %s2808_s25 }
 0x51f   : > { %v1628_v7 = vpop.f32.mrb[16].mxu1 }
 0x520   : > { %v1400_v9 = vpop.f32.mrb[8].mxu0  ;;  %1801 = vrot.lane.b32.xlu1 %v1628_v7, %s2583_s14  ;;  %v2248_v10 = vpop.f32.mrb[17].mxu1  ;;  %v2120_v7 = vld [vmem:[%s3073_s7] ss:$0 sm:$0xff]  ;;  %s2492_s14 = scalar_lea.vmem %s3023_s21, 128 }
 0x521   : > { %1789 = vrot.lane.b32.xlu0 %v1400_v9, %s2584_s16  ;;  %v2233_v11 = vpop.f32.mrb[9].mxu0  ;;  %v2121_v10 = vld [vmem:[%s3074_s8] ss:$0 sm:$0xff]  ;;  %p2493_p11 = scmp.ne.s32.totalorder %s3023_s21, %s2492_s14 }
 0x523   : > { %v1780_v12 = vpop.f32.mrb[18].mxu1  ;;  %p2494_p1 = pnand %p2493_p11, %p3091_p0 }
 0x524   : > { %v1552_v1 = vpop.f32.mrb[10].mxu0  ;;  %1809 = vrot.lane.b32.xlu1 %v1780_v12, %s2585_s23  ;;  %v2258_v13 = vpop.f32.mrb[19].mxu1 }
 0x525   : > { %1797 = vrot.lane.b32.xlu0 %v1552_v1, %s2586_s20  ;;  %v2243_v14 = vpop.f32.mrb[11].mxu0  ;;  %p2495_p3 = pneg %p2494_p1 }
 0x528   : > { %v1704_v15 = vpop.f32.mrb[12].mxu0 }
 0x529   : > { %1805 = vrot.lane.b32.xlu0 %v1704_v15, %s2587_s22  ;;  %v2253_v16 = vpop.f32.mrb[13].mxu0  ;;  %s2123_s22 = sshll.u32 %s2660_s13, 7  ;;  %s2588_s13 = smov [#allocation8]  }
 0x52a   : > { %s3021_s15 = scalar_lea.hbm %s3075_s9, %s2123_s22  ;;  %s2496_s18 = sshll.u32 %s2588_s13, 4  ;;  %s2497_s18 = int_to_ptr.vmem [resolvable:$false] %s2496_s18 }
 0x52b   : > { %s2498_s16 = scalar_lea.vmem %s2497_s18, 256  ;;  %p2499_p7 = scmp.lt.s32.totalorder %s3023_s21, %s2497_s18 }
 0x52c   : > { %p2500_p9 = scmp.lt.s32.totalorder %s2498_s16, %s2492_s14 }
 0x52e   : > { %p2501_p12 = por %p2500_p9, %p2499_p7 }
 0x530   : > { %p2502_p2 = pnand %p2501_p12, %p2495_p3 }
 0x586   : > { %v1786_v18 = vpop.permute.xlu1 %1785 }
 0x587   : > { %v1812_v21 = vsel %vm480_vm2, %v1248_v63, %v1786_v18 }
 0x58e   : > { %v1794_v19 = vpop.permute.xlu1 %1793 }
 0x592   : > { %v1802_v24 = vpop.permute.xlu1 %1801 }
 0x593   : > { %v1790_v22 = vpop.permute.xlu0 %1789 }
 0x594   : > { %v1813_v23 = vsel %vm1087_vm3, %v1812_v21, %v1790_v22 }
 0x595   : > { %v1815_v25 = vsel %vm1814_vm4, %v1813_v23, %v1794_v19 }
 0x596   : > { %v1810_v30 = vpop.permute.xlu1 %1809 }
 0x597   : > { %v1798_v26 = vpop.permute.xlu0 %1797 }
 0x598   : > { %v1817_v27 = vsel %vm1816_vm5, %v1815_v25, %v1798_v26 }
 0x599   : > { %v1819_v28 = vsel %vm1818_vm6, %v1817_v27, %v1802_v24 }
 0x59b   : > { %v1806_v29 = vpop.permute.xlu0 %1805 }
 0x59c   : > { %v1821_v31 = vsel %vm1820_vm7, %v1819_v28, %v1806_v29 }
 0x59d   : > { %v1823_v32 = vsel %vm1822_vm8, %v1821_v31, %v1810_v30 }
 0x59e   : > { %v1824_v33 = vsel %vm389_vm1, %v1823_v32, 0.0 }
 0x59f   : > { %1825 = vadd.xlane.f32.xlu0 %v1824_v33 }
 0x62c   : > { %v1826_v34 = vpop.xlane.xlu0 %1825 }
 0x62d   : > { %v1827_v35 = vmul.f32 0.03125, %v1826_v34 }
 0x62f   : > { %v1828_v36 = vsub.f32 %v1823_v32, %v1827_v35 }
 0x631   : > { %v1829_v37 = vmul.f32 %v1828_v36, %v1828_v36 }
 0x633   : > { %v1830_v38 = vsel %vm389_vm1, %v1829_v37, 0.0 }
 0x634   : > { %1831 = vadd.xlane.f32.xlu1 %v1830_v38 }
 0x6c1   : > { %v1832_v43 = vpop.xlane.xlu1 %1831 }
 0x6c2   : > { %v1833_v44 = vmul.f32 0.03125, %v1832_v43 }
 0x6c4   : > { %v1834_v45 = vmax.f32 %v1833_v44, 0.0 }
 0x6c6   : > { %v1835_v46 = vadd.f32 1e-05, %v1834_v45 }
 0x6c8   : > { %2402 = vrsqrt.f32 %v1835_v46 }
 0x6d2   : > { %v2403_v47 = vpop.eup %2402 }
 0x6d3   : > { %v1837_v49 = vmul.f32 %v2403_v47, %v1828_v36 }
 0x6d5   : > { %v1845_v51 = vmul.f32 %v2116_v48, %v1837_v49 }
 0x6d7   : > { %v1853_v52 = vadd.f32 %v2117_v50, %v1845_v51 }
 0x6d9   : > { %v1854_v53 = vmax.f32 %v1853_v52, 0.0 }
 0x6db   : > { %v1855_v0 = vmin.f32 %v1854_v53, 6.0 }
 0x6dd   : > { %v1856_v54 = vadd.f32 %v1855_v0, %v2829_v8 }
 0x6df   : > { %2268 = vmatmul.mubr.msk.f32.vlgmr.msra.gmra.mrb[14].mxu0 %vm389_vm1, %v1856_v54 }
 0x7b2   : > { %v1937_v56 = vpop.f32.mrb[14].mxu0 }
 0x7b3   : > { %v1938_v57 = vadd.f32 %v2118_v55, %v1937_v56  ;;  %v2269_v58 = vpop.f32.mrb[15].mxu0 }
 0x7b5   : > { %v1941_v59 = vsel %vm389_vm1, %v1938_v57, 0.0 }
 0x7b6   : > { %1942 = vadd.xlane.f32.xlu0 %v1941_v59 }
 0x843   : > { %v1943_v60 = vpop.xlane.xlu0 %1942 }
 0x844   : > { %v1944_v61 = vmul.f32 0.03125, %v1943_v60 }
 0x846   : > { %v1945_v62 = vsub.f32 %v1938_v57, %v1944_v61 }
 0x848   : > { %v1946_v63 = vmul.f32 %v1945_v62, %v1945_v62 }
 0x84a   : > { %v1947_v8 = vsel %vm389_vm1, %v1946_v63, 0.0 }
 0x84b   : > { %1948 = vadd.xlane.f32.xlu0 %v1947_v8 }
 0x8d8   : > { %v1949_v2 = vpop.xlane.xlu0 %1948 }
 0x8d9   : > { %v1950_v3 = vmul.f32 0.03125, %v1949_v2 }
 0x8db   : > { %v1951_v4 = vmax.f32 %v1950_v3, 0.0 }
 0x8dd   : > { %v1952_v5 = vadd.f32 1e-05, %v1951_v4 }
 0x8df   : > { %2404 = vrsqrt.f32 %v1952_v5 }
 0x8e9   : > { %v2405_v6 = vpop.eup %2404 }
 0x8ea   : > { %v1954_v9 = vmul.f32 %v2405_v6, %v1945_v62 }
 0x8ec   : > { %v1962_v11 = vmul.f32 %v2120_v7, %v1954_v9 }
 0x8ee   : > { %v1970_v12 = vadd.f32 %v2121_v10, %v1962_v11 }
 0x8f0   : > { %v1971_v1 = vmax.f32 %v1970_v12, 0.0 }
 0x8f2   : > { %v1972_v13 = vmin.f32 %v1971_v1, 6.0 }
 0x8f4   : > { %v1973_v14 = vadd.f32 %v1972_v13, %v1856_v54 }
 0x8f6   : > { %1974 = vst.msk [vmem:[%s376_s29] sm:$0xff] %vm389_vm1, %v1973_v14 }
 0x8f7   : > { %2505 = shalt.err (!%p2502_p2)
}
 0x8f8   : > { %s2506_s25 = scalar_lea.hbm %s3021_s15, 128  ;;  %s2510_s22 = scalar_lea.hbm %s3075_s9, 256 }
 0x8f9   : > { %p2507_p13 = scmp.ne.s32.totalorder %s3021_s15, %s2506_s25  ;;  %p2511_p4 = scmp.lt.u32.totalorder %s3021_s15, %s3075_s9 }
 0x8fa   : > { %p2512_p5 = scmp.lt.u32.totalorder %s2510_s22, %s2506_s25  ;;  %p2514_p11 = scmp.lt.u32.totalorder %s2506_s25, %s3021_s15 }
 0x8fb   : > { %p2508_p6 = pnand %p2507_p13, %p3091_p0 }
 0x8fc   : > { %p2513_p8 = por %p2512_p5, %p2511_p4 }
 0x8fd   : > { %p2509_p10 = pneg %p2508_p6 }
 0x8fe   : > { %p2515_p1 = por %p2514_p11, %p2513_p8 }
 0x900   : > { %p2516_p3 = pnand %p2515_p1, %p2509_p10 }
 0x902   : > { %2519 = shalt.err (!%p2516_p3)
}
 0x903   : > { %2292 = dma.vmem_to_hbm [thread:$0]  (%p3091_p0), %s3023_s21, 128, %s3021_s15, %s1976_s17  }
 0x904 PF: > { %s3092_s28 = sld [smem:[#allocation12_spill]]  ;;  %s2001_s14 = sand.u32 1, %s2550_s30  }
 0x905   : > { %p3094_p9 = scmp.ge.s32.totalorder %s2562_s12, 2  ;;  %s2002_s13 = scalar_lea.sflag [#allocation4], %s2001_s14 }
 0x90a   : > { %p3093_p7 = scmp.ne.s32.totalorder %s3092_s28, 0 }
 0x90c   : > { %p2306_p12 = pnand %p3094_p9, %p3093_p7 }
 0x90e   : > { %2545 = dma.done.wait (!%p2306_p12), %s2002_s13, 128  }
 0x90f   : > { %2547 = vsyncadd (!%p2306_p12), %s2002_s13, 4294967168  ;;  %p23_p2 = scmp.ge.s32.totalorder %s2749_s24, 4   ;;  %s3095_s30 = smov %s2554_s10 }
 0x910   : > { %s3096_s10 = smov %s2558_s11  ;;  %s3097_s11 = smov %s2765_s27 }
 0x911   : > { %s3098_s12 = smov %s2749_s24  ;;  %25 = sbr.rel (!%p23_p2) target bundleno = 6 (0x6), region = 109 }
 0x918   :  { %2007 = vsyncpa [#allocation3], 1 }
 0x919   :  { %2009 = vsyncpa [#allocation3 + $0x1], 1 }
 0x91a   :  { %2010 = vsyncpa [#allocation6], 1 }
 0x91b   :  { %2011 = vsyncpa [#allocation4], 1 }
 0x91c   :  { %2013 = vsyncpa [#allocation4 + $0x1], 1 }

</bundles_post_ra>
